<compile_context>
chip_gen: v5e
topology: v5e:2x2
jax: 0.10.0
libtpu: 0.0.40
codegen_flags: <defaults>
</compile_context>

<pallas_src>
import functools

import jax
import jax.numpy as jnp
from jax.experimental import pallas as pl
from jax.experimental.pallas import tpu as pltpu

# Lane widths tried for the free-reshape slab (widest first: denser DMA rows).
_SLAB_WIDTHS = (512, 256, 128)
_CHUNK_ELEMS = 8 * 1024            # 8 f32 vregs per inner chunk of the score loop
_SCORE_BLOCK_ELEMS = 256 * 1024    # ~1 MiB f32 per score block
_FQ_BLOCK_ELEMS = 512 * 1024       # ~2 MiB f32 per fake-quant block
NUM_SCORE_CORES = 2                # leading "parallel" axis (2 TCs on v7x, neutral elsewhere)
_VMEM_LIMIT = 32 * 1024 * 1024     # safe on v5e (16 MiB default) and v7x (64 MiB physical)


def _round_up(v, m):
    return -(-v // m) * m


# ----------------------------------------------------------------------------
# Kernel 1: per-candidate SSE of the scaled-space quantization error.
#   real SSE = delta^2 * scaled SSE  (applied in glue);  score = SSE / N.
# ----------------------------------------------------------------------------
def _score_kernel(inv_d_ref, zp_ref, x_ref, score_ref, *,
                  n_levels, block_rows, chunk_rows, lanes,
                  nb_per_core, last_block, tail_rows, tail_lanes):
    c = pl.program_id(0)                     # core-split axis ("parallel")
    i = pl.program_id(1)                     # row-block axis ("arbitrary" / reduction)
    g = c * nb_per_core + i                  # global block index

    @pl.when(i == 0)
    def _init():
        score_ref[...] = jnp.zeros_like(score_ref)

    qmax = float(n_levels - 1)
    inv_d = [inv_d_ref[k] for k in range(3)]
    zp = [zp_ref[k] for k in range(3)]

    n_full = block_rows // chunk_rows
    rem_rows = block_rows - n_full * chunk_rows

    def err2(xc, k):
        xs = xc * inv_d[k]                               # scalar reciprocal, no vdiv
        xq = jnp.clip(jnp.round(xs) + zp[k], 0.0, qmax)
        e = xs - (xq - zp[k])                            # scaled-space error
        return e * e

    def chunk_mask(row0, rows_c):
        # Only the LAST block can contain invalid rows / a ragged last row;
        # tail_rows / tail_lanes are block-local Python constants.
        row = row0 + jax.lax.broadcasted_iota(jnp.int32, (rows_c, lanes), 0)
        if tail_lanes == 0:
            return row < tail_rows
        lane = jax.lax.broadcasted_iota(jnp.int32, (rows_c, lanes), 1)
        return (row < tail_rows) | ((row == tail_rows) & (lane < tail_lanes))

    def run(masked):
        if n_full > 0:
            def body(ci, accs):
                r0 = pl.multiple_of(ci * chunk_rows, chunk_rows)
                xc = x_ref[pl.ds(r0, chunk_rows), :].astype(jnp.float32)
                m = chunk_mask(r0, chunk_rows) if masked else None
                new = []
                for k in range(3):
                    e2 = err2(xc, k)
                    if m is not None:
                        e2 = jnp.where(m, e2, 0.0)
                    # pure-VALU fold of the chunk down to one (8, lanes) slab
                    folded = e2.reshape(chunk_rows // 8, 8, lanes).sum(axis=0)
                    new.append(accs[k] + folded)
                return tuple(new)

            init = tuple(jnp.zeros((8, lanes), jnp.float32) for _ in range(3))
            accs = jax.lax.fori_loop(0, n_full, body, init)
            for k in range(3):
                score_ref[k, :, :] += accs[k]

        if rem_rows > 0:                     # only for small (single-block) tensors
            r0 = n_full * chunk_rows
            xc = x_ref[pl.ds(r0, rem_rows), :].astype(jnp.float32)
            m = chunk_mask(r0, rem_rows) if masked else None
            for k in range(3):
                e2 = err2(xc, k)
                if m is not None:
                    e2 = jnp.where(m, e2, 0.0)
                if rem_rows % 8 == 0:
                    score_ref[k, :, :] += e2.reshape(rem_rows // 8, 8, lanes).sum(axis=0)
                else:
                    score_ref[k, 0:1, :] += e2.sum(axis=0, keepdims=True)

    block_has_tail = (tail_rows < block_rows) or (tail_lanes > 0)
    if block_has_tail:
        @pl.when(g == last_block)
        def _tail():
            run(True)

        @pl.when(g != last_block)
        def _full():
            run(False)
    else:
        run(False)                            # no masked path emitted at all


# ----------------------------------------------------------------------------
# Kernel 2: fake-quant forward:  x -> (clamp(round(x*inv_d)+z, 0, L-1) - z) * d
# ----------------------------------------------------------------------------
def _fake_quant_kernel(scale_ref, x_ref, o_ref, *, n_levels):
    inv_d = scale_ref[0]
    d = scale_ref[1]
    zp = scale_ref[2]
    x = x_ref[...].astype(jnp.float32)        # upcast in-register (bf16 stays 2B in HBM)
    xq = jnp.clip(jnp.round(x * inv_d) + zp, 0.0, float(n_levels - 1))
    o_ref[...] = ((xq - zp) * d).astype(o_ref.dtype)


# ----------------------------------------------------------------------------
# Glue helpers
# ----------------------------------------------------------------------------
def _slab_view(x):
    """Reshape x to a lane-dense 2-D slab; free (no copy) when a width divides n."""
    flat = x.reshape(-1)
    n = flat.shape[0]
    for w in _SLAB_WIDTHS:
        if n % w == 0:
            return flat.reshape(n // w, w), n, 0
    w = _SLAB_WIDTHS[-1]                      # rare fallback: zero-pad the last row
    rows = -(-n // w)
    pad = rows * w - n
    flat = jnp.pad(flat, (0, pad))
    return flat.reshape(rows, w), n, pad


def _score_geometry(rows, lanes):
    chunk = max(8, _CHUNK_ELEMS // lanes)             # 64 / 32 / 16 rows
    target = max(chunk, _SCORE_BLOCK_ELEMS // lanes)  # multiple of chunk
    if rows <= target:
        return rows, chunk, 1                         # single full-dim block, one core
    block_rows = target
    nb = -(-rows // block_rows)
    if nb % NUM_SCORE_CORES != 0:
        # nudge block size down so the block count splits evenly across cores
        nb2 = _round_up(nb, NUM_SCORE_CORES)
        br2 = _round_up(-(-rows // nb2), chunk)
        if br2 > 0 and (-(-rows // br2)) % NUM_SCORE_CORES == 0:
            return br2, chunk, NUM_SCORE_CORES
        return block_rows, chunk, 1
    return block_rows, chunk, NUM_SCORE_CORES


def _candidate_scores(x2d, deltas, zps, n, n_levels):
    rows, lanes = x2d.shape
    block_rows, chunk_rows, ncores = _score_geometry(rows, lanes)
    nb = -(-rows // block_rows)
    nb_per_core = nb // ncores

    valid_rows = n // lanes                   # fully valid rows of the slab
    valid_lanes = n % lanes                   # valid lanes in the ragged row (0 if none)
    last_block = nb - 1
    tail_rows = valid_rows - last_block * block_rows   # block-local, baked constant

    kern = functools.partial(
        _score_kernel, n_levels=n_levels, block_rows=block_rows,
        chunk_rows=chunk_rows, lanes=lanes, nb_per_core=nb_per_core,
        last_block=last_block, tail_rows=tail_rows, tail_lanes=valid_lanes)

    inv_deltas = (1.0 / deltas).astype(jnp.float32)
    partial = pl.pallas_call(
        kern,
        out_shape=jax.ShapeDtypeStruct((ncores, 3, 8, lanes), jnp.float32),
        grid=(ncores, nb_per_core),
        in_specs=[
            pl.BlockSpec(memory_space=pltpu.MemorySpace.SMEM),   # 1/delta   (3,)
            pl.BlockSpec(memory_space=pltpu.MemorySpace.SMEM),   # zero_pt   (3,)
            pl.BlockSpec((block_rows, lanes),
                         lambda c, i: (c * nb_per_core + i, 0)),
        ],
        out_specs=pl.BlockSpec((None, 3, 8, lanes), lambda c, i: (c, 0, 0, 0)),
        compiler_params=pltpu.CompilerParams(
            dimension_semantics=("parallel", "arbitrary"),
            vmem_limit_bytes=_VMEM_LIMIT),
    )(inv_deltas, zps.astype(jnp.float32), x2d)

    sse_scaled = jnp.sum(partial, axis=(0, 2, 3))                 # (3,)
    # real-space SSE = delta^2 * scaled SSE; score = mean squared error.
    return (deltas.astype(jnp.float32) ** 2) * sse_scaled / jnp.float32(n)


def _fake_quant_2d(x2d, delta, zero_point, n_levels):
    rows, lanes = x2d.shape
    target = max(8, _FQ_BLOCK_ELEMS // lanes)
    fq_rows = rows if rows <= target else target
    nb = -(-rows // fq_rows)                  # partial last block handled by Pallas masking

    d = jnp.asarray(delta, jnp.float32)
    scale = jnp.stack([1.0 / d, d, jnp.asarray(zero_point, jnp.float32)])
    kern = functools.partial(_fake_quant_kernel, n_levels=n_levels)
    return pl.pallas_call(
        kern,
        out_shape=jax.ShapeDtypeStruct((rows, lanes), x2d.dtype),
        grid=(nb,),
        in_specs=[
            pl.BlockSpec(memory_space=pltpu.MemorySpace.SMEM),   # [1/d, d, zp]
            pl.BlockSpec((fq_rows, lanes), lambda i: (i, 0)),
        ],
        out_specs=pl.BlockSpec((fq_rows, lanes), lambda i: (i, 0)),
        compiler_params=pltpu.CompilerParams(
            dimension_semantics=("parallel",),
            vmem_limit_bytes=_VMEM_LIMIT),
    )(scale, x2d)


# ----------------------------------------------------------------------------
# Module wrapper (mirrors the PyTorch class semantics / statefulness)
# ----------------------------------------------------------------------------
class UniformQuantizer:
    def __init__(self, n_bits: int = 8, channel_wise: bool = False):
        self.n_bits = n_bits
        self.n_levels = 2 ** n_bits
        self.delta = None
        self.zero_point = None
        self.inited = False
        self.channel_wise = channel_wise

    def set_inited(self, inited: bool = True):
        self.inited = inited

    def _init_scale(self, flat_valid, x2d, n):
        # torch.quantile (sort-based, linear interpolation) stays in JAX glue;
        # one call sorts the tensor once for all 6 probabilities (init-only).
        flat = flat_valid
        if flat.dtype != jnp.float32:
            flat = flat.astype(jnp.float32)
        pcts = jnp.array([0.999, 0.9999, 0.99999], jnp.float32)
        probs = jnp.concatenate([pcts, 1.0 - pcts])
        qs = jnp.quantile(flat, probs)
        new_maxes, new_mins = qs[:3], qs[3:]
        deltas = (new_maxes - new_mins) / (2 ** self.n_bits - 1)
        deltas = jnp.maximum(deltas, 1e-8)    # guard degenerate (constant) tensors
        zps = jnp.round(-new_mins / deltas)

        scores = _candidate_scores(x2d, deltas, zps, n, self.n_levels)

        # sequential strict-< selection, matching the torch loop
        best = jnp.float32(1e10)
        delta = jnp.float32(0.0)
        zero_point = jnp.float32(0.0)
        for c in range(3):
            better = scores[c] < best
            delta = jnp.where(better, deltas[c], delta)
            zero_point = jnp.where(better, zps[c], zero_point)
            best = jnp.where(better, scores[c], best)
        return delta, zero_point

    def init_quantization_scale(self, x, channel_wise: bool = False):
        if channel_wise:
            # TODO(synk): channel_wise=True (per-channel quantile recursion) not implemented.
            raise NotImplementedError("channel_wise=True not implemented")
        x = jnp.asarray(x)
        x2d, n, _ = _slab_view(x)
        return self._init_scale(x.reshape(-1), x2d, n)

    def forward(self, x):
        x = jnp.asarray(x)
        shape = x.shape
        x2d, n, pad = _slab_view(x)           # free reshape (no pad/astype) in the common case

        if self.inited is False:
            self.delta, self.zero_point = self._init_scale(x.reshape(-1), x2d, n)
            self.inited = True

        out2d = _fake_quant_2d(x2d, self.delta, self.zero_point, self.n_levels)
        if pad:                               # only when the fallback padded path was taken
            return out2d.reshape(-1)[:n].reshape(shape)
        return out2d.reshape(shape)

    __call__ = forward


# ----------------------------------------------------------------------------
# Pure-JAX reference (same math, no Pallas) for a sanity check
# ----------------------------------------------------------------------------
def _reference_forward(x, n_bits=8):
    # Matches the torch quantizer up to reciprocal-vs-divide rounding at exact
    # quantization boundaries (intentional deviation, same form as the kernels).
    n_levels = 2 ** n_bits
    flat = x.reshape(-1).astype(jnp.float32)
    best = jnp.float32(1e10)
    d_b = jnp.float32(0.0)
    z_b = jnp.float32(0.0)
    for pct in (0.999, 0.9999, 0.99999):
        nmax = jnp.quantile(flat, pct)
        nmin = jnp.quantile(flat, 1.0 - pct)
        d = (nmax - nmin) / (n_levels - 1)
        z = jnp.round(-nmin / d)
        xq = (jnp.clip(jnp.round(x * (1.0 / d)) + z, 0, n_levels - 1) - z) * d
        score = jnp.mean(jnp.abs(x - xq) ** 2)
        better = score < best
        d_b = jnp.where(better, d, d_b)
        z_b = jnp.where(better, z, z_b)
        best = jnp.where(better, score, best)
    return (jnp.clip(jnp.round(x * (1.0 / d_b)) + z_b, 0, n_levels - 1) - z_b) * d_b


if __name__ == "__main__":
    key = jax.random.PRNGKey(0)
    # PyTorch conv activations are NCHW; the quantizer is elementwise so layout-free.
    x = jax.random.normal(key, (2, 4, 16, 16), dtype=jnp.float32)

    quantizer = UniformQuantizer(n_bits=8, channel_wise=False)
    y = jax.block_until_ready(quantizer(x))

    y_ref = jax.block_until_ready(_reference_forward(x, n_bits=8))
    assert y.shape == x.shape and y.dtype == x.dtype
    assert jnp.allclose(y, y_ref, atol=1e-5, rtol=1e-5), float(jnp.max(jnp.abs(y - y_ref)))

    print("KERNEL_OK")
</pallas_src>

<mosaic_0001>
module attributes {stable_mosaic.version = 11 : i64} {
  func.func @_score_kernel(%arg0: i32, %arg1: i32, %arg2: memref<3xf32, #tpu.memory_space<smem>>, %arg3: memref<3xf32, #tpu.memory_space<smem>>, %arg4: memref<4x512xf32, #tpu.memory_space<vmem>>, %arg5: memref<1x3x8x512xf32, #tpu.memory_space<vmem>>) attributes {dimension_semantics = [#tpu.dimension_semantics<parallel>, #tpu.dimension_semantics<arbitrary>], iteration_bounds = array<i64: 1, 1>, scalar_prefetch = 0 : i64, scratch_operands = 0 : i64, tpu.core_type = #tpu.core_type<tc>, window_params = [{transform_indices = @transform_0, window_bounds = array<i64: 3>}, {transform_indices = @transform_1, window_bounds = array<i64: 3>}, {transform_indices = @transform_2, window_bounds = array<i64: 4, 512>}, {transform_indices = @transform_3, window_bounds = array<i64: 1, 3, 8, 512>}]} {
    %c0_i32 = arith.constant 0 : i32
    %0 = arith.cmpi eq, %arg1, %c0_i32 : i32
    %1 = arith.extui %0 : i1 to i32
    %c0_i32_0 = arith.constant 0 : i32
    %2 = arith.cmpi ne, %1, %c0_i32_0 : i32
    scf.if %2 {
      %cst_38 = arith.constant 0.000000e+00 : f32
      %73 = vector.broadcast %cst_38 : f32 to vector<3x8x512xf32>
      %c0_39 = arith.constant 0 : index
      %c0_40 = arith.constant 0 : index
      %c0_41 = arith.constant 0 : index
      %c0_42 = arith.constant 0 : index
      %74 = vector.load %arg5[%c0_39, %c0_40, %c0_41, %c0_42] : memref<1x3x8x512xf32, #tpu.memory_space<vmem>>, vector<1x3x8x512xf32>
      %75 = vector.shape_cast %74 : vector<1x3x8x512xf32> to vector<3x8x512xf32>
      %76 = vector.shape_cast %73 : vector<3x8x512xf32> to vector<1x3x8x512xf32>
      tpu.vector_store %arg5[%c0_39, %c0_40, %c0_41, %c0_42], %76 {strides = array<i32>} : memref<1x3x8x512xf32, #tpu.memory_space<vmem>>, vector<1x3x8x512xf32>,
    } else {
    }
    %c0 = arith.constant 0 : index
    %3 = memref.load %arg2[%c0] : memref<3xf32, #tpu.memory_space<smem>>
    %c1 = arith.constant 1 : index
    %4 = memref.load %arg2[%c1] : memref<3xf32, #tpu.memory_space<smem>>
    %c2 = arith.constant 2 : index
    %5 = memref.load %arg2[%c2] : memref<3xf32, #tpu.memory_space<smem>>
    %c0_1 = arith.constant 0 : index
    %6 = memref.load %arg3[%c0_1] : memref<3xf32, #tpu.memory_space<smem>>
    %c1_2 = arith.constant 1 : index
    %7 = memref.load %arg3[%c1_2] : memref<3xf32, #tpu.memory_space<smem>>
    %c2_3 = arith.constant 2 : index
    %8 = memref.load %arg3[%c2_3] : memref<3xf32, #tpu.memory_space<smem>>
    %c0_4 = arith.constant 0 : index
    %c0_5 = arith.constant 0 : index
    %9 = vector.load %arg4[%c0_4, %c0_5] : memref<4x512xf32, #tpu.memory_space<vmem>>, vector<4x512xf32>
    %10 = vector.broadcast %3 : f32 to vector<4x512xf32>
    %11 = arith.mulf %9, %10 : vector<4x512xf32>
    %12 = math.roundeven %11 : vector<4x512xf32>
    %13 = vector.broadcast %6 : f32 to vector<4x512xf32>
    %14 = arith.addf %12, %13 : vector<4x512xf32>
    %cst = arith.constant 0.000000e+00 : f32
    %cst_6 = arith.constant 2.550000e+02 : f32
    %15 = vector.broadcast %cst : f32 to vector<4x512xf32>
    %16 = arith.maximumf %15, %14 : vector<4x512xf32>
    %17 = vector.broadcast %cst_6 : f32 to vector<4x512xf32>
    %18 = arith.minimumf %17, %16 : vector<4x512xf32>
    %19 = vector.broadcast %6 : f32 to vector<4x512xf32>
    %20 = arith.subf %18, %19 : vector<4x512xf32>
    %21 = arith.subf %11, %20 : vector<4x512xf32>
    %22 = arith.mulf %21, %21 : vector<4x512xf32>
    %c0_7 = arith.constant 0 : index
    %c0_8 = arith.constant 0 : index
    %c0_9 = arith.constant 0 : index
    %c0_10 = arith.constant 0 : index
    %23 = vector.load %arg5[%c0_7, %c0_8, %c0_9, %c0_10] : memref<1x3x8x512xf32, #tpu.memory_space<vmem>>, vector<1x1x1x512xf32>
    %24 = vector.shape_cast %23 : vector<1x1x1x512xf32> to vector<1x512xf32>
    %cst_11 = arith.constant dense<0.000000e+00> : vector<512xf32>
    %25 = vector.multi_reduction <add>, %22, %cst_11 [0] : vector<4x512xf32> to vector<512xf32>
    %26 = vector.shape_cast %25 : vector<512xf32> to vector<1x512xf32>
    %27 = arith.addf %24, %26 : vector<1x512xf32>
    %c0_12 = arith.constant 0 : index
    %c0_13 = arith.constant 0 : index
    %c0_14 = arith.constant 0 : index
    %c0_15 = arith.constant 0 : index
    %28 = vector.load %arg5[%c0_12, %c0_13, %c0_14, %c0_15] : memref<1x3x8x512xf32, #tpu.memory_space<vmem>>, vector<1x1x1x512xf32>
    %29 = vector.shape_cast %28 : vector<1x1x1x512xf32> to vector<1x512xf32>
    %30 = vector.shape_cast %27 : vector<1x512xf32> to vector<1x1x1x512xf32>
    tpu.vector_store %arg5[%c0_12, %c0_13, %c0_14, %c0_15], %30 {strides = array<i32>} : memref<1x3x8x512xf32, #tpu.memory_space<vmem>>, vector<1x1x1x512xf32>,
    %31 = vector.broadcast %4 : f32 to vector<4x512xf32>
    %32 = arith.mulf %9, %31 : vector<4x512xf32>
    %33 = math.roundeven %32 : vector<4x512xf32>
    %34 = vector.broadcast %7 : f32 to vector<4x512xf32>
    %35 = arith.addf %33, %34 : vector<4x512xf32>
    %cst_16 = arith.constant 0.000000e+00 : f32
    %cst_17 = arith.constant 2.550000e+02 : f32
    %36 = vector.broadcast %cst_16 : f32 to vector<4x512xf32>
    %37 = arith.maximumf %36, %35 : vector<4x512xf32>
    %38 = vector.broadcast %cst_17 : f32 to vector<4x512xf32>
    %39 = arith.minimumf %38, %37 : vector<4x512xf32>
    %40 = vector.broadcast %7 : f32 to vector<4x512xf32>
    %41 = arith.subf %39, %40 : vector<4x512xf32>
    %42 = arith.subf %32, %41 : vector<4x512xf32>
    %43 = arith.mulf %42, %42 : vector<4x512xf32>
    %c0_18 = arith.constant 0 : index
    %c1_19 = arith.constant 1 : index
    %c0_20 = arith.constant 0 : index
    %c0_21 = arith.constant 0 : index
    %44 = vector.load %arg5[%c0_18, %c1_19, %c0_20, %c0_21] : memref<1x3x8x512xf32, #tpu.memory_space<vmem>>, vector<1x1x1x512xf32>
    %45 = vector.shape_cast %44 : vector<1x1x1x512xf32> to vector<1x512xf32>
    %cst_22 = arith.constant dense<0.000000e+00> : vector<512xf32>
    %46 = vector.multi_reduction <add>, %43, %cst_22 [0] : vector<4x512xf32> to vector<512xf32>
    %47 = vector.shape_cast %46 : vector<512xf32> to vector<1x512xf32>
    %48 = arith.addf %45, %47 : vector<1x512xf32>
    %c0_23 = arith.constant 0 : index
    %c1_24 = arith.constant 1 : index
    %c0_25 = arith.constant 0 : index
    %c0_26 = arith.constant 0 : index
    %49 = vector.load %arg5[%c0_23, %c1_24, %c0_25, %c0_26] : memref<1x3x8x512xf32, #tpu.memory_space<vmem>>, vector<1x1x1x512xf32>
    %50 = vector.shape_cast %49 : vector<1x1x1x512xf32> to vector<1x512xf32>
    %51 = vector.shape_cast %48 : vector<1x512xf32> to vector<1x1x1x512xf32>
    tpu.vector_store %arg5[%c0_23, %c1_24, %c0_25, %c0_26], %51 {strides = array<i32>} : memref<1x3x8x512xf32, #tpu.memory_space<vmem>>, vector<1x1x1x512xf32>,
    %52 = vector.broadcast %5 : f32 to vector<4x512xf32>
    %53 = arith.mulf %9, %52 : vector<4x512xf32>
    %54 = math.roundeven %53 : vector<4x512xf32>
    %55 = vector.broadcast %8 : f32 to vector<4x512xf32>
    %56 = arith.addf %54, %55 : vector<4x512xf32>
    %cst_27 = arith.constant 0.000000e+00 : f32
    %cst_28 = arith.constant 2.550000e+02 : f32
    %57 = vector.broadcast %cst_27 : f32 to vector<4x512xf32>
    %58 = arith.maximumf %57, %56 : vector<4x512xf32>
    %59 = vector.broadcast %cst_28 : f32 to vector<4x512xf32>
    %60 = arith.minimumf %59, %58 : vector<4x512xf32>
    %61 = vector.broadcast %8 : f32 to vector<4x512xf32>
    %62 = arith.subf %60, %61 : vector<4x512xf32>
    %63 = arith.subf %53, %62 : vector<4x512xf32>
    %64 = arith.mulf %63, %63 : vector<4x512xf32>
    %c0_29 = arith.constant 0 : index
    %c2_30 = arith.constant 2 : index
    %c0_31 = arith.constant 0 : index
    %c0_32 = arith.constant 0 : index
    %65 = vector.load %arg5[%c0_29, %c2_30, %c0_31, %c0_32] : memref<1x3x8x512xf32, #tpu.memory_space<vmem>>, vector<1x1x1x512xf32>
    %66 = vector.shape_cast %65 : vector<1x1x1x512xf32> to vector<1x512xf32>
    %cst_33 = arith.constant dense<0.000000e+00> : vector<512xf32>
    %67 = vector.multi_reduction <add>, %64, %cst_33 [0] : vector<4x512xf32> to vector<512xf32>
    %68 = vector.shape_cast %67 : vector<512xf32> to vector<1x512xf32>
    %69 = arith.addf %66, %68 : vector<1x512xf32>
    %c0_34 = arith.constant 0 : index
    %c2_35 = arith.constant 2 : index
    %c0_36 = arith.constant 0 : index
    %c0_37 = arith.constant 0 : index
    %70 = vector.load %arg5[%c0_34, %c2_35, %c0_36, %c0_37] : memref<1x3x8x512xf32, #tpu.memory_space<vmem>>, vector<1x1x1x512xf32>
    %71 = vector.shape_cast %70 : vector<1x1x1x512xf32> to vector<1x512xf32>
    %72 = vector.shape_cast %69 : vector<1x512xf32> to vector<1x1x1x512xf32>
    tpu.vector_store %arg5[%c0_34, %c2_35, %c0_36, %c0_37], %72 {strides = array<i32>} : memref<1x3x8x512xf32, #tpu.memory_space<vmem>>, vector<1x1x1x512xf32>,
    return
  }
  func.func @transform_0(%arg0: i32, %arg1: i32) -> i32 {
    %c0_i32 = arith.constant 0 : i32
    %c0_i32_0 = arith.constant 0 : i32
    return %c0_i32 : i32
  }
  func.func @transform_1(%arg0: i32, %arg1: i32) -> i32 {
    %c0_i32 = arith.constant 0 : i32
    %c0_i32_0 = arith.constant 0 : i32
    return %c0_i32 : i32
  }
  func.func @transform_2(%arg0: i32, %arg1: i32) -> (i32, i32) {
    %c1_i32 = arith.constant 1 : i32
    %0 = arith.muli %arg0, %c1_i32 : i32
    %1 = arith.addi %0, %arg1 : i32
    %c0_i32 = arith.constant 0 : i32
    %c0_i32_0 = arith.constant 0 : i32
    return %1, %c0_i32 : i32, i32
  }
  func.func @transform_3(%arg0: i32, %arg1: i32) -> (i32, i32, i32, i32) {
    %c0_i32 = arith.constant 0 : i32
    %c0_i32_0 = arith.constant 0 : i32
    %c0_i32_1 = arith.constant 0 : i32
    %c0_i32_2 = arith.constant 0 : i32
    return %arg0, %c0_i32, %c0_i32_0, %c0_i32_1 : i32, i32, i32, i32
  }
}

</mosaic_0001>

<bundles_post_ra>
// kernel: tpu_custom_call.1
= control target key start
LH: loop header
LB: loop body
LE: loop exit
PB: predicated region body
PF: predicated region fallthrough
CT: control target
= control target key end

     0   :  { %8 = vsyncpa [#allocation5], 0  ;;  %s635_s0 = inlined_call_operand.hbm [shape: f32[3], index: 0, kind: input, shape index: {}]   ;;  %s636_s1 = inlined_call_operand.hbm [shape: f32[3], index: 1, kind: input, shape index: {}]   ;;  %s637_s2 = inlined_call_operand.hbm [shape: f32[4,512], index: 2, kind: input, shape index: {}]   ;;  %s638_s3 = inlined_call_operand.hbm [shape: f32[1,3,8,512], index: 3, kind: output, shape index: {}]  }
   0x1   :  { %9 = vsyncpa [#allocation7], 0 }
   0x2   :  { %10 = vsyncpa [#allocation3], 0 }
   0x3   :  { %11 = vsyncpa [#allocation4], 0  ;;  %s17_s14 = sshll.u32 %s635_s0, 4  ;;  %s26_s17 = sshll.u32 %s636_s1, 4  ;;  %s18_s14 = int_to_ptr.hbm [resolvable:$true] %s17_s14  ;;  %s27_s17 = int_to_ptr.hbm [resolvable:$true] %s26_s17 }
   0x4   :  { %s475_s18 = smov [#allocation2]   ;;  %s476_s19 = smov [#allocation6]  }
   0x5   :  { %20 = dma.hbm_to_smem %s18_s14, 16, %s475_s18, [#allocation5]  }
   0x6   :  { %29 = dma.hbm_to_smem %s27_s17, 16, %s476_s19, [#allocation7]  }
   0x7   :  { %s39_s22 = sshll.u32 %s637_s2, 4  ;;  %s477_s23 = smov [#allocation8]   ;;  %s40_s22 = int_to_ptr.hbm [resolvable:$true] %s39_s22 }
   0x8   :  { %s41_s24 = sshll.u32 %s477_s23, 4  ;;  %s42_s24 = int_to_ptr.vmem [resolvable:$true] %s41_s24 }
   0x9   :  { %44 = dma.hbm_to_vmem [thread:$0]  %s40_s22, 256, %s42_s24, [#allocation3]  }
   0xa   :  { %467 = dma.done.wait [#allocation5], 16  }
   0xb   :  { %468 = vsyncadd [#allocation5], 4294967280 }
   0xc   :  { %469 = dma.done.wait [#allocation7], 16  }
   0xd   :  { %470 = vsyncadd [#allocation7], 4294967280 }
   0xe   :  { %471 = dma.done.wait [#allocation3], 256  }
   0xf   :  { %472 = vsyncadd [#allocation3], 4294967040 }
  0x10   :  { %57 = sfence }
  0x11   :  { %s75_s0 = sld [smem:[#allocation2]]  ;;  %v81_v0 = vld [vmem:[#allocation8] sm:$0xff]  ;;  %v82_v1 = vld [vmem:[#allocation8 + $0x8] sm:$0xff]  ;;  %vm115_vm6 = vcmask 1043456   ;;  %vm151_vm7 = vcmask 1040384   ;;  %vm153_vm8 = vcmask 1042434  }
  0x12   :  { %s336_s1 = sld [smem:[#allocation2 + $0x1]]  ;;  %vm155_vm9 = vcmask 1041408   ;;  %s479_s28 = smov [#allocation9]  }
  0x13   :  { %s337_s25 = sld [smem:[#allocation2 + $0x2]]  ;;  %s319_s29 = sshll.u32 %s479_s28, 4  ;;  %s320_s29 = int_to_ptr.vmem [resolvable:$true] %s319_s29 }
  0x14   :  { %s78_s26 = sld [smem:[#allocation6]]  ;;  %s321_s5 = sshll.u32 %s638_s3, 4  ;;  %s322_s5 = int_to_ptr.hbm [resolvable:$true] %s321_s5 }
  0x15   :  { %s517_s2 = sld [smem:[#allocation6 + $0x1]]  ;;  %s480_s6 = smov 512  }
  0x16   :  { %s540_s27 = sld [smem:[#allocation6 + $0x2]]  ;;  %s481_s7 = smov 32  }
  0x17   :  { %v83_v2 = vstv %s75_s0 }
  0x18   :  { %v511_v3 = vmul.f32 %v83_v2, %v81_v0  ;;  %v165_v4 = vstv %s336_s1  ;;  %v513_v5 = vmul.f32 %v83_v2, %v82_v1 }
  0x19   :  { %v515_v6 = vmul.f32 %v165_v4, %v81_v0  ;;  %v240_v7 = vstv %s337_s25  ;;  %v522_v11 = vmul.f32 %v165_v4, %v82_v1 }
  0x1a   :  { %v340_v8 = vand.u32 2147483647, %v511_v3  ;;  %v342_v9 = vcvt.f32.s32 %v511_v3  ;;  %v345_v10 = vand.u32 2147483648, %v511_v3  ;;  %v524_v12 = vstv %s78_s26 }
  0x1b   :  { %v526_v13 = vmul.f32 %v240_v7, %v81_v0  ;;  %v348_v14 = vand.u32 2147483647, %v513_v5  ;;  %v350_v15 = vcvt.f32.s32 %v513_v5  ;;  %v353_v17 = vand.u32 2147483648, %v513_v5 }
  0x1c   :  { %v343_v16 = vcvt.s32.f32 %v342_v9  ;;  %v531_v18 = vmul.f32 %v240_v7, %v82_v1  ;;  %v356_v19 = vand.u32 2147483647, %v515_v6  ;;  %vm534_vm0 = vcmp.lt.f32.partialorder %v340_v8, 8388608.0 }
  0x1d   :  { %v374_v21 = vcvt.f32.s32 %v526_v13  ;;  %v377_v22 = vand.u32 2147483648, %v526_v13  ;;  %v351_v23 = vcvt.s32.f32 %v350_v15  ;;  %vm542_vm1 = vcmp.lt.f32.partialorder %v348_v14, 8388608.0 }
  0x1e   :  { %v344_v24 = vand.u32 2147483647, %v343_v16  ;;  %v382_v26 = vcvt.f32.s32 %v531_v18  ;;  %v385_v27 = vand.u32 2147483648, %v531_v18  ;;  %vm548_vm2 = vcmp.lt.f32.partialorder %v356_v19, 8388608.0 }
  0x1f   :  { %v375_v28 = vcvt.s32.f32 %v374_v21  ;;  %v352_v29 = vand.u32 2147483647, %v351_v23  ;;  %v358_v31 = vcvt.f32.s32 %v515_v6  ;;  %v361_v34 = vand.u32 2147483648, %v515_v6 }
  0x20   :  { %v346_v32 = vor.u32 %v345_v10, %v344_v24  ;;  %v383_v33 = vcvt.s32.f32 %v382_v26  ;;  %v364_v35 = vand.u32 2147483647, %v522_v11  ;;  %v170_v38 = vstv %s517_s2 }
  0x21   :  { %v354_v36 = vor.u32 %v353_v17, %v352_v29  ;;  %v359_v37 = vcvt.s32.f32 %v358_v31  ;;  %v366_v39 = vcvt.f32.s32 %v522_v11  ;;  %v369_v41 = vand.u32 2147483648, %v522_v11 }
  0x22   :  { %v347_v40 = vsel %vm534_vm0, %v346_v32, %v511_v3  ;;  %v372_v42 = vand.u32 2147483647, %v526_v13  ;;  %v376_v43 = vand.u32 2147483647, %v375_v28  ;;  %vm567_vm3 = vcmp.lt.f32.partialorder %v364_v35, 8388608.0 }
  0x23   :  { %v89_v44 = vadd.f32 %v347_v40, %v524_v12  ;;  %v355_v45 = vsel %vm542_vm1, %v354_v36, %v513_v5  ;;  %v360_v46 = vand.u32 2147483647, %v359_v37  ;;  %v367_v47 = vcvt.s32.f32 %v366_v39 }
  0x24   :  { %v90_v48 = vadd.f32 %v355_v45, %v524_v12  ;;  %vm373_vm4 = vcmp.lt.f32.partialorder %v372_v42, 8388608.0  ;;  %v378_v50 = vor.u32 %v377_v22, %v376_v43  ;;  %v572_v54 = vstv %s540_s27 }
  0x25   :  { %v91_v51 = vmax.f32 %v89_v44, 0.0  ;;  %v362_v52 = vor.u32 %v361_v34, %v360_v46  ;;  %v368_v53 = vand.u32 2147483647, %v367_v47  ;;  %v380_v57 = vand.u32 2147483647, %v531_v18 }
  0x26   :  { %v92_v55 = vmax.f32 %v90_v48, 0.0  ;;  %v379_v56 = vsel %vm373_vm4, %v378_v50, %v526_v13  ;;  %v384_v58 = vand.u32 2147483647, %v383_v33  ;;  %v478_v14 = vmov 0.0  }
  0x27   :  { %v93_v59 = vmin.f32 %v91_v51, 255.0  ;;  %v363_v60 = vsel %vm548_vm2, %v362_v52, %v515_v6  ;;  %v370_v61 = vor.u32 %v369_v41, %v368_v53  ;;  %v246_v0 = vadd.f32 %v379_v56, %v572_v54  ;;  %63 = vst [vmem:[#allocation9] sm:$0xff] %v478_v14 }
  0x28   :  { %v94_v62 = vmin.f32 %v92_v55, 255.0  ;;  %v171_v63 = vadd.f32 %v363_v60, %v170_v38  ;;  %vm580_vm5 = vcmp.lt.f32.partialorder %v380_v57, 8388608.0  ;;  %v386_v7 = vor.u32 %v385_v27, %v384_v58  ;;  %64 = vst [vmem:[#allocation9 + $0x8] sm:$0xff] %v478_v14 }
  0x29   :  { %v95_v2 = vsub.f32 %v93_v59, %v524_v12  ;;  %v371_v4 = vsel %vm567_vm3, %v370_v61, %v522_v11  ;;  %v248_v21 = vmax.f32 %v246_v0, 0.0  ;;  %65 = vst [vmem:[#allocation9 + $0x10] sm:$0xff] %v478_v14 }
  0x2a   :  { %v96_v8 = vsub.f32 %v94_v62, %v524_v12  ;;  %v173_v9 = vmax.f32 %v171_v63, 0.0  ;;  %v172_v10 = vadd.f32 %v371_v4, %v170_v38  ;;  %v387_v16 = vsel %vm580_vm5, %v386_v7, %v531_v18  ;;  %66 = vst [vmem:[#allocation9 + $0x18] sm:$0xff] %v478_v14 }
  0x2b   :  { %v97_v15 = vsub.f32 %v511_v3, %v95_v2  ;;  %v247_v12 = vadd.f32 %v387_v16, %v572_v54  ;;  %67 = vst [vmem:[#allocation9 + $0x20] sm:$0xff] %v478_v14  ;;  %v250_v28 = vmin.f32 %v248_v21, 255.0 }
  0x2c   :  { %v98_v17 = vsub.f32 %v513_v5, %v96_v8  ;;  %v175_v19 = vmin.f32 %v173_v9, 255.0  ;;  %v174_v20 = vmax.f32 %v172_v10, 0.0  ;;  %68 = vst [vmem:[#allocation9 + $0x28] sm:$0xff] %v478_v14  ;;  %v159_v9 = vlaneseq }
  0x2d   :  { %v99_v22 = vmul.f32 %v97_v15, %v97_v15  ;;  %v249_v3 = vmax.f32 %v247_v12, 0.0  ;;  %69 = vst [vmem:[#allocation9 + $0x30] sm:$0xff] %v478_v14  ;;  %v252_v31 = vsub.f32 %v250_v28, %v572_v54 }
  0x2e   :  { %v100_v23 = vmul.f32 %v98_v17, %v98_v17  ;;  %v177_v24 = vsub.f32 %v175_v19, %v170_v38  ;;  %v176_v25 = vmin.f32 %v174_v20, 255.0  ;;  %70 = vst [vmem:[#allocation9 + $0x38] sm:$0xff] %v478_v14  ;;  %vm609_vm10 = vcmp.lt.s32.totalorder %v159_v9, 512 }
  0x2f   :  { %104 = vst [vmem:[#allocation1] ss:$2 sm:$0xff] %v99_v22  ;;  %v251_v30 = vmin.f32 %v249_v3, 255.0  ;;  %v254_v39 = vsub.f32 %v526_v13, %v252_v31 }
  0x30   :  { %106 = vst [vmem:[#allocation1 + $0x10] ss:$2 sm:$0xff] %v100_v23  ;;  %v179_v26 = vsub.f32 %v515_v6, %v177_v24  ;;  %v178_v27 = vsub.f32 %v176_v25, %v170_v38 }
  0x31   :  { %71 = vst [vmem:[#allocation9 + $0x40] sm:$0xff] %v478_v14  ;;  %v253_v36 = vsub.f32 %v251_v30, %v572_v54  ;;  %v256_v51 = vmul.f32 %v254_v39, %v254_v39 }
  0x32   :  { %v180_v5 = vsub.f32 %v522_v11, %v178_v27  ;;  %v181_v29 = vmul.f32 %v179_v26, %v179_v26  ;;  %72 = vst [vmem:[#allocation9 + $0x48] sm:$0xff] %v478_v14 }
  0x33   :  { %73 = vst [vmem:[#allocation9 + $0x50] sm:$0xff] %v478_v14  ;;  %v255_v47 = vsub.f32 %v531_v18, %v253_v36 }
  0x34   :  { %v182_v34 = vmul.f32 %v180_v5, %v180_v5  ;;  %74 = vst [vmem:[#allocation9 + $0x58] sm:$0xff] %v478_v14 }
  0x35   :  { %v257_v59 = vmul.f32 %v255_v47, %v255_v47 }
  0x36   :  { %v107_v32 = vld.sshfl [vmem:[#allocation1] sm:$0xff pattern:$0x75316420]  ;;  %v108_v33 = vld.sshfl [vmem:[#allocation1 + $0x8] sm:$0xff pattern:$0x75316420] }
  0x37   :  { %v116_v35 = vsel %vm115_vm6, %v107_v32, 0.0  ;;  %v123_v6 = vsel %vm115_vm6, %v108_v33, 0.0  ;;  %187 = vst [vmem:[#allocation1] ss:$2 sm:$0xff] %v181_v29 }
  0x38   :  { %v117_v11 = vrot.slane %v116_v35, 4  ;;  %v124_v37 = vrot.slane %v123_v6, 4  ;;  %v109_v38 = vld.sshfl [vmem:[#allocation1 + $0x10] sm:$0xff pattern:$0x75316420] }
  0x39   :  { %v110_v40 = vld.sshfl [vmem:[#allocation1 + $0x18] sm:$0xff pattern:$0x75316420]  ;;  %v130_v41 = vsel %vm115_vm6, %v109_v38, 0.0 }
  0x3a   :  { %v118_v42 = vadd.f32 %v117_v11, %v116_v35  ;;  %v125_v43 = vadd.f32 %v124_v37, %v123_v6  ;;  %v131_v44 = vrot.slane %v130_v41, 4  ;;  %v137_v45 = vsel %vm115_vm6, %v110_v40, 0.0  ;;  %189 = vst [vmem:[#allocation1 + $0x10] ss:$2 sm:$0xff] %v182_v34 }
  0x3b   :  { %v138_v46 = vrot.slane %v137_v45, 4  ;;  %v101_v34 = vld [vmem:[#allocation9] ss:$8 sm:$0xf] }
  0x3c   :  { %v119_v48 = vrot.slane %v118_v42, 2  ;;  %v126_v49 = vrot.slane %v125_v43, 2  ;;  %v132_v50 = vadd.f32 %v131_v44, %v130_v41 }
  0x3d   :  { %v139_v52 = vadd.f32 %v138_v46, %v137_v45 }
  0x3e   :  { %v120_v13 = vadd.f32 %v119_v48, %v118_v42  ;;  %v127_v53 = vadd.f32 %v126_v49, %v125_v43  ;;  %v133_v54 = vrot.slane %v132_v50, 2  ;;  %v190_v55 = vld.sshfl [vmem:[#allocation1] sm:$0xff pattern:$0x75316420] }
  0x3f   :  { %v140_v56 = vrot.slane %v139_v52, 2  ;;  %v191_v57 = vld.sshfl [vmem:[#allocation1 + $0x8] sm:$0xff pattern:$0x75316420]  ;;  %v198_v58 = vsel %vm115_vm6, %v190_v55, 0.0 }
  0x40   :  { %v128_v60 = vrot.slane %v127_v53, 1  ;;  %v134_v61 = vadd.f32 %v133_v54, %v132_v50  ;;  %v199_v62 = vrot.slane %v198_v58, 4  ;;  %262 = vst [vmem:[#allocation1] ss:$2 sm:$0xff] %v256_v51  ;;  %v121_v18 = vrot.slane %v120_v13, 1 }
  0x41   :  { %v141_v63 = vadd.f32 %v140_v56, %v139_v52  ;;  %v205_v0 = vsel %vm115_vm6, %v191_v57, 0.0  ;;  %v192_v1 = vld.sshfl [vmem:[#allocation1 + $0x10] sm:$0xff pattern:$0x75316420] }
  0x42   :  { %v129_v2 = vadd.f32 %v128_v60, %v127_v53  ;;  %v135_v4 = vrot.slane %v134_v61, 1  ;;  %v200_v7 = vadd.f32 %v199_v62, %v198_v58  ;;  %v193_v8 = vld.sshfl [vmem:[#allocation1 + $0x18] sm:$0xff pattern:$0x75316420]  ;;  %v206_v14 = vrot.slane %v205_v0, 4 }
  0x43   :  { %v142_v10 = vrot.slane %v141_v63, 1  ;;  %v212_v15 = vsel %vm115_vm6, %v192_v1, 0.0  ;;  %v219_v16 = vsel %vm115_vm6, %v193_v8, 0.0  ;;  %264 = vst [vmem:[#allocation1 + $0x10] ss:$2 sm:$0xff] %v257_v59  ;;  %v122_v22 = vadd.f32 %v121_v18, %v120_v13 }
  0x44   :  { %v148_v17 = vrot.slane %v129_v2, 7  ;;  %v136_v19 = vadd.f32 %v135_v4, %v134_v61  ;;  %v201_v20 = vrot.slane %v200_v7, 2  ;;  %v213_v21 = vrot.slane %v212_v15, 4  ;;  %v184_v4 = vld [vmem:[#allocation9 + $0x20] ss:$8 sm:$0xf] }
  0x45   :  { %v143_v12 = vadd.f32 %v142_v10, %v141_v63  ;;  %v207_v23 = vadd.f32 %v206_v14, %v205_v0  ;;  %v220_v24 = vrot.slane %v219_v16, 4 }
  0x46   :  { %v149_v25 = vrot.slane %v136_v19, 6  ;;  %v202_v3 = vadd.f32 %v201_v20, %v200_v7  ;;  %v214_v26 = vadd.f32 %v213_v21, %v212_v15  ;;  %v152_v28 = vsel %vm151_vm7, %v122_v22, %v148_v17 }
  0x47   :  { %v150_v5 = vrot.slane %v143_v12, 5  ;;  %v208_v29 = vrot.slane %v207_v23, 2  ;;  %v221_v30 = vadd.f32 %v220_v24, %v219_v16  ;;  %v265_v31 = vld.sshfl [vmem:[#allocation1] sm:$0xff pattern:$0x75316420] }
  0x48   :  { %v203_v32 = vrot.slane %v202_v3, 1  ;;  %v215_v33 = vrot.slane %v214_v26, 2  ;;  %v273_v35 = vsel %vm115_vm6, %v265_v31, 0.0  ;;  %v266_v37 = vld.sshfl [vmem:[#allocation1 + $0x8] sm:$0xff pattern:$0x75316420] }
  0x49   :  { %v154_v6 = vsel %vm153_vm8, %v149_v25, %v150_v5  ;;  %v209_v36 = vadd.f32 %v208_v29, %v207_v23  ;;  %v222_v11 = vrot.slane %v221_v30, 2  ;;  %v274_v38 = vrot.slane %v273_v35, 4  ;;  %v259_v5 = vld [vmem:[#allocation9 + $0x40] ss:$8 sm:$0xf] }
  0x4a   :  { %v216_v39 = vadd.f32 %v215_v33, %v214_v26  ;;  %v156_v40 = vsel %vm155_vm9, %v152_v28, %v154_v6  ;;  %v267_v41 = vld.sshfl [vmem:[#allocation1 + $0x10] sm:$0xff pattern:$0x75316420]  ;;  %v268_v42 = vld.sshfl [vmem:[#allocation1 + $0x18] sm:$0xff pattern:$0x75316420]  ;;  %v204_v57 = vadd.f32 %v203_v32, %v202_v3 }
  0x4b   :  { %v210_v43 = vrot.slane %v209_v36, 1  ;;  %v223_v44 = vadd.f32 %v222_v11, %v221_v30  ;;  %v158_v45 = vadd.f32 %v156_v40, %v101_v34  ;;  %v275_v46 = vadd.f32 %v274_v38, %v273_v35 }
  0x4c   :  { %v217_v47 = vrot.slane %v216_v39, 1  ;;  %v280_v48 = vsel %vm115_vm6, %v266_v37, 0.0  ;;  %v287_v49 = vsel %vm115_vm6, %v267_v41, 0.0  ;;  %v294_v50 = vsel %vm115_vm6, %v268_v42, 0.0 }
  0x4d   :  { %v211_v51 = vadd.f32 %v210_v43, %v209_v36  ;;  %v224_v52 = vrot.slane %v223_v44, 1  ;;  %163 = vst.msk [vmem:[#allocation9] ss:$8 sm:$0xf] %vm609_vm10, %v158_v45  ;;  %v276_v13 = vrot.slane %v275_v46, 2  ;;  %v281_v53 = vrot.slane %v280_v48, 4 }
  0x4e   :  { %v218_v54 = vadd.f32 %v217_v47, %v216_v39  ;;  %v288_v55 = vrot.slane %v287_v49, 4  ;;  %v295_v56 = vrot.slane %v294_v50, 4 }
  0x4f   :  { %v230_v58 = vrot.slane %v211_v51, 7  ;;  %v225_v59 = vadd.f32 %v224_v52, %v223_v44  ;;  %v282_v60 = vadd.f32 %v281_v53, %v280_v48  ;;  %v277_v1 = vadd.f32 %v276_v13, %v275_v46 }
  0x50   :  { %v231_v61 = vrot.slane %v218_v54, 6  ;;  %v289_v62 = vadd.f32 %v288_v55, %v287_v49  ;;  %v296_v18 = vadd.f32 %v295_v56, %v294_v50 }
  0x51   :  { %v232_v63 = vrot.slane %v225_v59, 5  ;;  %v233_v0 = vsel %vm151_vm7, %v204_v57, %v230_v58  ;;  %v283_v2 = vrot.slane %v282_v60, 2  ;;  %v278_v19 = vrot.slane %v277_v1, 1 }
  0x52   :  { %v290_v7 = vrot.slane %v289_v62, 2  ;;  %v297_v8 = vrot.slane %v296_v18, 2 }
  0x53   :  { %v234_v9 = vsel %vm153_vm8, %v231_v61, %v232_v63  ;;  %v284_v10 = vadd.f32 %v283_v2, %v282_v60  ;;  %v279_v25 = vadd.f32 %v278_v19, %v277_v1 }
  0x54   :  { %v235_v14 = vsel %vm155_vm9, %v233_v0, %v234_v9  ;;  %v291_v15 = vadd.f32 %v290_v7, %v289_v62  ;;  %v298_v16 = vadd.f32 %v297_v8, %v296_v18 }
  0x55   :  { %v237_v17 = vadd.f32 %v235_v14, %v184_v4  ;;  %v285_v20 = vrot.slane %v284_v10, 1 }
  0x56   :  { %v292_v21 = vrot.slane %v291_v15, 1  ;;  %v299_v22 = vrot.slane %v298_v16, 1 }
  0x57   :  { %238 = vst.msk [vmem:[#allocation9 + $0x20] ss:$8 sm:$0xf] %vm609_vm10, %v237_v17  ;;  %v286_v12 = vadd.f32 %v285_v20, %v284_v10 }
  0x58   :  { %v293_v23 = vadd.f32 %v292_v21, %v291_v15  ;;  %v300_v24 = vadd.f32 %v299_v22, %v298_v16 }
  0x59   :  { %v305_v3 = vrot.slane %v286_v12, 7 }
  0x5a   :  { %v306_v26 = vrot.slane %v293_v23, 6  ;;  %v307_v28 = vrot.slane %v300_v24, 5 }
  0x5b   :  { %v308_v29 = vsel %vm151_vm7, %v279_v25, %v305_v3 }
  0x5c   :  { %v309_v30 = vsel %vm153_vm8, %v306_v26, %v307_v28 }
  0x5d   :  { %v310_v31 = vsel %vm155_vm9, %v308_v29, %v309_v30 }
  0x5e   :  { %v312_v32 = vadd.f32 %v310_v31, %v259_v5 }
  0x60   :  { %313 = vst.msk [vmem:[#allocation9 + $0x40] ss:$8 sm:$0xf] %vm609_vm10, %v312_v32 }
  0x61   :  { %327 = dma.vmem_to_hbm [thread:$0]  %s320_s29, 1536, %s322_s5, [#allocation4], %s480_s6, %s480_s6, %s481_s7  }
  0x62   :  { %473 = dma.done.wait [#allocation4], 1536  }
  0x63   :  { %474 = vsyncadd [#allocation4], 4294965760 }
  0x64   :  { %332 = vsyncpa [#allocation3], 1 }
  0x65   :  { %333 = vsyncpa [#allocation4], 1 }
  0x66   :  { %334 = vsyncpa [#allocation5], 1 }
  0x67   :  { %335 = vsyncpa [#allocation7], 1 }

</bundles_post_ra>
